<compile_context>
chip_gen: v7x
topology: tpu7x:2x2x1
jax: 0.10.0
libtpu: 0.0.40
codegen_flags: <defaults>
</compile_context>

<pallas_src>
import jax
import jax.numpy as jnp
from jax.experimental import pallas as pl
from jax.experimental.pallas import tpu as pltpu

HIDDEN_SIZE = 32          # config.hidden_size (small synthetic value)
OUT_SIZE = 256
INIT_NORMAL_STD = 0.01    # config.init_normal_std (synthetic, deterministic)

DEFAULT_TM = 4096                      # rows (of M = L*B) per grid step
VMEM_LIMIT_BYTES = 48 * 1024 * 1024    # safe on v7x (64 MiB) and v5e/v6e


def reduce_hidden_kernel(code_ref, ast_ref, name_ref, w_ref, b_ref, o_ref):
    # code/ast/name_ref: (TM, H)  w_ref: (3H, N)  b_ref: (1, N)  o_ref: (TM, N)
    # Fused "concat + matmul": build the (TM, 3H) activation block via a lane
    # concat (XLU) and run ONE K=3H MXU dot instead of three under-filled
    # K=H dots.
    x = jnp.concatenate(
        (code_ref[...], ast_ref[...], name_ref[...]), axis=1)
    acc = jnp.dot(x, w_ref[...], preferred_element_type=jnp.float32)
    acc += b_ref[...]                       # bias broadcast over rows
    o_ref[...] = jnp.maximum(acc, 0.0).astype(o_ref.dtype)


def _pick_tile(m, tm_target):
    """Row-tile size honoring the (8,128) rule, with an even grid count so the
    M axis splits across both v7x TensorCores when it is tiled at all."""
    if tm_target >= m:
        return m, 1                          # full-extent block is always legal
    steps = pl.cdiv(m, tm_target)
    if steps > 1 and steps % 2 == 1:
        steps += 1                           # even grid -> both v7x TCs busy
    tm = ((pl.cdiv(m, steps) + 7) // 8) * 8  # multiple of 8 (f32 sublane)
    if tm >= m:
        return m, 1
    return tm, pl.cdiv(m, tm)


def reduce_hidden(code_hidden, ast_hidden, name_hidden, weight, bias, *,
                  tm=DEFAULT_TM):
    """Pallas equivalent of ReduceHidden.forward.

    code_hidden/ast_hidden/name_hidden: (L, B, H)
    weight: (3H, 256)  (transposed vs. torch's (256, 3H))
    bias:   (256,)
    returns (L, B, 256)
    """
    L, B, H = code_hidden.shape
    M = L * B
    N = weight.shape[1]

    # Free reshapes of contiguous arrays (no concat -> no (M, 3H) HBM temp).
    code2d = code_hidden.reshape(M, H)
    ast2d = ast_hidden.reshape(M, H)
    name2d = name_hidden.reshape(M, H)
    b2d = bias.reshape(1, N)

    tm, grid_m = _pick_tile(M, tm)

    x_spec = pl.BlockSpec((tm, H), lambda i: (i, 0))       # streamed over M
    w_spec = pl.BlockSpec((3 * H, N), lambda i: (0, 0))    # resident
    b_spec = pl.BlockSpec((1, N), lambda i: (0, 0))        # resident
    o_spec = pl.BlockSpec((tm, N), lambda i: (i, 0))       # lane-dense output

    cost = pl.CostEstimate(
        flops=2 * M * (3 * H) * N,
        transcendentals=0,
        bytes_accessed=4 * (3 * M * H + 3 * H * N + N + M * N),
    )

    out2d = pl.pallas_call(
        reduce_hidden_kernel,
        out_shape=jax.ShapeDtypeStruct((M, N), code_hidden.dtype),
        grid_spec=pltpu.PrefetchScalarGridSpec(
            num_scalar_prefetch=0,
            grid=(grid_m,),
            in_specs=[x_spec, x_spec, x_spec, w_spec, b_spec],
            out_specs=o_spec,
        ),
        compiler_params=pltpu.CompilerParams(
            dimension_semantics=("parallel",),     # megacore sharding on v7x
            vmem_limit_bytes=VMEM_LIMIT_BYTES,
        ),
        cost_estimate=cost,
    )(code2d, ast2d, name2d, weight, b2d)

    return out2d.reshape(L, B, N)


def _reference(code_hidden, ast_hidden, name_hidden, weight, bias):
    x = jnp.concatenate((code_hidden, ast_hidden, name_hidden), axis=2)
    return jnp.maximum(x @ weight + bias, 0.0)


if __name__ == "__main__":
    key = jax.random.PRNGKey(0)
    k1, k2, k3, kw, kb = jax.random.split(key, 5)

    # Small shape consistent with the module (GRU hidden state layout).
    L, B, H = 1, 2, HIDDEN_SIZE
    code_hidden = jax.random.normal(k1, (L, B, H), dtype=jnp.float32)
    ast_hidden = jax.random.normal(k2, (L, B, H), dtype=jnp.float32)
    name_hidden = jax.random.normal(k3, (L, B, H), dtype=jnp.float32)

    # deterministic "init_linear_wt": N(0, init_normal_std) for weight & bias
    weight = INIT_NORMAL_STD * jax.random.normal(
        kw, (3 * H, OUT_SIZE), dtype=jnp.float32)
    bias = INIT_NORMAL_STD * jax.random.normal(
        kb, (OUT_SIZE,), dtype=jnp.float32)

    out = reduce_hidden(code_hidden, ast_hidden, name_hidden, weight, bias)
    jax.block_until_ready(out)
    ref = _reference(code_hidden, ast_hidden, name_hidden, weight, bias)
    assert out.shape == (L, B, OUT_SIZE)
    assert jnp.allclose(out, ref, atol=1e-5, rtol=1e-5)

    # Second check: multi-step M grid with a partial last tile
    # (M = 126, tm -> 64, grid = 2, last tile = 62 rows -> masked store path).
    L2, B2 = 7, 18
    c2 = jax.random.normal(k1, (L2, B2, H), dtype=jnp.float32)
    a2 = jax.random.normal(k2, (L2, B2, H), dtype=jnp.float32)
    n2 = jax.random.normal(k3, (L2, B2, H), dtype=jnp.float32)
    out2 = reduce_hidden(c2, a2, n2, weight, bias, tm=64)
    jax.block_until_ready(out2)
    ref2 = _reference(c2, a2, n2, weight, bias)
    assert out2.shape == (L2, B2, OUT_SIZE)
    assert jnp.allclose(out2, ref2, atol=1e-5, rtol=1e-5)

    print("KERNEL_OK")
</pallas_src>

<mosaic_0001>
module attributes {stable_mosaic.version = 11 : i64} {
  func.func @reduce_hidden_kernel(%arg0: i32, %arg1: memref<2x32xf32, #tpu.memory_space<vmem>>, %arg2: memref<2x32xf32, #tpu.memory_space<vmem>>, %arg3: memref<2x32xf32, #tpu.memory_space<vmem>>, %arg4: memref<96x256xf32, #tpu.memory_space<vmem>>, %arg5: memref<1x256xf32, #tpu.memory_space<vmem>>, %arg6: memref<2x256xf32, #tpu.memory_space<vmem>>) attributes {dimension_semantics = [#tpu.dimension_semantics<parallel>], iteration_bounds = array<i64: 1>, scalar_prefetch = 0 : i64, scratch_operands = 0 : i64, tpu.core_type = #tpu.core_type<tc>, window_params = [{transform_indices = @transform_0, window_bounds = array<i64: 2, 32>}, {transform_indices = @transform_1, window_bounds = array<i64: 2, 32>}, {transform_indices = @transform_2, window_bounds = array<i64: 2, 32>}, {pipeline_mode = #tpu.pipeline_mode<synchronous>, transform_indices = @transform_3, window_bounds = array<i64: 96, 256>}, {pipeline_mode = #tpu.pipeline_mode<synchronous>, transform_indices = @transform_4, window_bounds = array<i64: 1, 256>}, {transform_indices = @transform_5, window_bounds = array<i64: 2, 256>}]} {
    %c0 = arith.constant 0 : index
    %c0_0 = arith.constant 0 : index
    %0 = vector.load %arg1[%c0, %c0_0] : memref<2x32xf32, #tpu.memory_space<vmem>>, vector<2x32xf32>
    %c0_1 = arith.constant 0 : index
    %c0_2 = arith.constant 0 : index
    %1 = vector.load %arg2[%c0_1, %c0_2] : memref<2x32xf32, #tpu.memory_space<vmem>>, vector<2x32xf32>
    %c0_3 = arith.constant 0 : index
    %c0_4 = arith.constant 0 : index
    %2 = vector.load %arg3[%c0_3, %c0_4] : memref<2x32xf32, #tpu.memory_space<vmem>>, vector<2x32xf32>
    %3 = tpu.concatenate %0, %1, %2 in 1 : vector<2x32xf32>, vector<2x32xf32>, vector<2x32xf32> -> vector<2x96xf32>
    %c0_5 = arith.constant 0 : index
    %c0_6 = arith.constant 0 : index
    %4 = vector.load %arg4[%c0_5, %c0_6] : memref<96x256xf32, #tpu.memory_space<vmem>>, vector<96x256xf32>
    %cst = arith.constant dense<0.000000e+00> : vector<2x256xf32>
    %5 = tpu.matmul %3, %4, %cst {dimension_numbers = #tpu.dot_dimension_numbers<[1], [0], [0], [1], [0, 0, 1, 1], [], []>} : vector<2x96xf32>, vector<96x256xf32>, vector<2x256xf32> -> vector<2x256xf32>
    %c0_7 = arith.constant 0 : index
    %c0_8 = arith.constant 0 : index
    %6 = vector.load %arg5[%c0_7, %c0_8] : memref<1x256xf32, #tpu.memory_space<vmem>>, vector<1x256xf32>
    %7 = vector.broadcast %6 : vector<1x256xf32> to vector<2x256xf32>
    %8 = arith.addf %5, %7 : vector<2x256xf32>
    %cst_9 = arith.constant 0.000000e+00 : f32
    %9 = vector.broadcast %cst_9 : f32 to vector<2x256xf32>
    %10 = arith.maximumf %8, %9 : vector<2x256xf32>
    %c0_10 = arith.constant 0 : index
    %c0_11 = arith.constant 0 : index
    %11 = vector.load %arg6[%c0_10, %c0_11] : memref<2x256xf32, #tpu.memory_space<vmem>>, vector<2x256xf32>
    tpu.vector_store %arg6[%c0_10, %c0_11], %10 {strides = array<i32>} : memref<2x256xf32, #tpu.memory_space<vmem>>, vector<2x256xf32>,
    return
  }
  func.func @transform_0(%arg0: i32) -> (i32, i32) {
    %c0_i32 = arith.constant 0 : i32
    %c0_i32_0 = arith.constant 0 : i32
    return %arg0, %c0_i32 : i32, i32
  }
  func.func @transform_1(%arg0: i32) -> (i32, i32) {
    %c0_i32 = arith.constant 0 : i32
    %c0_i32_0 = arith.constant 0 : i32
    return %arg0, %c0_i32 : i32, i32
  }
  func.func @transform_2(%arg0: i32) -> (i32, i32) {
    %c0_i32 = arith.constant 0 : i32
    %c0_i32_0 = arith.constant 0 : i32
    return %arg0, %c0_i32 : i32, i32
  }
  func.func @transform_3(%arg0: i32) -> (i32, i32) {
    %c0_i32 = arith.constant 0 : i32
    %c0_i32_0 = arith.constant 0 : i32
    %c0_i32_1 = arith.constant 0 : i32
    return %c0_i32, %c0_i32_0 : i32, i32
  }
  func.func @transform_4(%arg0: i32) -> (i32, i32) {
    %c0_i32 = arith.constant 0 : i32
    %c0_i32_0 = arith.constant 0 : i32
    %c0_i32_1 = arith.constant 0 : i32
    return %c0_i32, %c0_i32_0 : i32, i32
  }
  func.func @transform_5(%arg0: i32) -> (i32, i32) {
    %c0_i32 = arith.constant 0 : i32
    %c0_i32_0 = arith.constant 0 : i32
    return %arg0, %c0_i32 : i32, i32
  }
}

</mosaic_0001>

<bundles_post_ra>
// kernel: tpu_custom_call.1
= control target key start
LH: loop header
LB: loop body
LE: loop exit
PB: predicated region body
PF: predicated region fallthrough
CT: control target
= control target key end

     0   :  { %10 = vsyncpa [#allocation3], 0  ;;  %s399_s0 = inlined_call_operand.hbm [shape: f32[2,32], index: 0, kind: input, shape index: {}]   ;;  %s400_s1 = inlined_call_operand.vmem [shape: f32[2,32], index: 1, kind: input, shape index: {}]   ;;  %s401_s2 = inlined_call_operand.vmem [shape: f32[2,32], index: 2, kind: input, shape index: {}]   ;;  %s402_s3 = inlined_call_operand.hbm [shape: f32[96,256], index: 3, kind: input, shape index: {}]   ;;  %s403_s4 = inlined_call_operand.vmem [shape: f32[1,256], index: 4, kind: input, shape index: {}]   ;;  %s404_s5 = inlined_call_operand.hbm [shape: f32[2,256], index: 5, kind: output, shape index: {}]  }
   0x1   :  { %11 = vsyncpa [#allocation6], 0 }
   0x2   :  { %12 = vsyncpa [#allocation4], 0  ;;  %s309_s18 = smov [#allocation2]   ;;  %s310_s20 = smov [#allocation5]  }
   0x3   :  { %s19_s19 = sshll.u32 %s309_s18, 4  ;;  %s32_s21 = sshll.u32 %s310_s20, 4  ;;  %s20_s19 = int_to_ptr.vmem [resolvable:$true] %s19_s19  ;;  %s347_s21 = int_to_ptr.vmem [resolvable:$true] %s32_s21 }
   0x4   :  { %s237_s24 = scalar_lea.hbm %s399_s0, 32 }
   0x5   :  { %p238_p0 = scmp.ne.s32.totalorder %s399_s0, %s237_s24  ;;  %p241_p1 = scmp.lt.u32.totalorder %s237_s24, %s399_s0 }
   0x7   :  { %p243_p2 = pnand %p241_p1, %p238_p0 }
   0x9   :  { %246 = shalt.err (!%p243_p2)
}
   0xa   :  { %s247_s29 = scalar_lea.vmem %s20_s19, 32  ;;  %p252_p4 = scmp.lt.s32.totalorder %s20_s19, %s20_s19 }
   0xb   :  { %p248_p3 = scmp.ne.s32.totalorder %s20_s19, %s247_s29  ;;  %p253_p5 = scmp.lt.s32.totalorder %s247_s29, %s247_s29 }
   0xd   :  { %p254_p6 = por %p253_p5, %p252_p4 }
   0xf   :  { %p255_p7 = pnand %p254_p6, %p248_p3 }
  0x11   :  { %258 = shalt.err (!%p255_p7)
}
  0x12   :  { %22 = dma.hbm_to_vmem [thread:$0]  %s399_s0, 32, %s20_s19, [#allocation3]  }
  0x13   :  { %s259_s9 = scalar_lea.hbm %s402_s3, 3072 }
  0x14   :  { %p260_p8 = scmp.ne.s32.totalorder %s402_s3, %s259_s9  ;;  %p263_p9 = scmp.lt.u32.totalorder %s259_s9, %s402_s3 }
  0x16   :  { %p265_p10 = pnand %p263_p9, %p260_p8 }
  0x18   :  { %268 = shalt.err (!%p265_p10)
}
  0x19   :  { %s269_s14 = scalar_lea.vmem %s347_s21, 3072  ;;  %p274_p12 = scmp.lt.s32.totalorder %s347_s21, %s347_s21 }
  0x1a   :  { %p270_p11 = scmp.ne.s32.totalorder %s347_s21, %s269_s14  ;;  %p275_p13 = scmp.lt.s32.totalorder %s269_s14, %s269_s14 }
  0x1c   :  { %p276_p0 = por %p275_p13, %p274_p12 }
  0x1e   :  { %p277_p1 = pnand %p276_p0, %p270_p11 }
  0x20   :  { %280 = shalt.err (!%p277_p1)
}
  0x21   :  { %s311_s0 = smov 256   ;;  %s312_s15 = smov 16  }
  0x22   :  { %38 = dma.hbm_to_vmem [thread:$0]  %s402_s3, 3072, %s347_s21, [#allocation6], %s311_s0, %s311_s0, %s312_s15  }
  0x23   :  { %303 = dma.done.wait [#allocation3], 32  }
  0x24   :  { %304 = vsyncadd [#allocation3], 4294967264 }
  0x25   :  { %305 = dma.done.wait [#allocation6], 3072  }
  0x26   :  { %306 = vsyncadd [#allocation6], 4294964224  ;;  %v313_v0 = vmov 0.0   ;;  %v48_v1 = vld [vmem:[%s400_s1] sm:$0x3]  ;;  %v63_v3 = vld [vmem:[#allocation5 + $0x8] sm:$0xff]  ;;  %v88_v44 = vlaneseq }
  0x27   :  { %166 = vmatprep.mubr.f32.mxu0 %v313_v0  ;;  %v49_v2 = vld [vmem:[%s401_s2] sm:$0x3]  ;;  %s314_s23 = smov 32   ;;  %v62_v5 = vld [vmem:[#allocation5] sm:$0xff]  ;;  %v64_v6 = vld [vmem:[#allocation5 + $0x10] sm:$0xff]  ;;  %s315_s1 = smov 64  }
  0x28   :  { %51 = vrot.lane.b32.xlu0 %v48_v1, %s314_s23  ;;  %v65_v4 = vld [vmem:[#allocation5 + $0x18] sm:$0xff]  ;;  %v207_v8 = vpack.c.bf16 %v64_v6, %v62_v5  ;;  %v67_v9 = vld [vmem:[#allocation5 + $0x28] sm:$0xff]  ;;  %v66_v11 = vld [vmem:[#allocation5 + $0x20] sm:$0xff]  ;;  %vm58_vm0 = vcmask 261120   ;;  %vm60_vm1 = vcmask 523264   ;;  %vm98_vm2 = vcmask 785408  }
  0x29   :  { %v205_v7 = vpack.c.bf16 %v65_v4, %v63_v3  ;;  %v69_v10 = vld [vmem:[#allocation5 + $0x38] sm:$0xff]  ;;  %v68_v13 = vld [vmem:[#allocation5 + $0x30] sm:$0xff]  ;;  %v71_v14 = vld [vmem:[#allocation5 + $0x48] sm:$0xff]  ;;  %v89_v45 = vshrl.u32 %v88_v44, 7  ;;  %s316_s21 = smov [#allocation7]  }
  0x2a   :  { %v209_v12 = vpack.c.bf16 %v69_v10, %v67_v9  ;;  %v73_v15 = vld [vmem:[#allocation5 + $0x58] sm:$0xff]  ;;  %v211_v16 = vpack.c.bf16 %v68_v13, %v66_v11  ;;  %v70_v18 = vld [vmem:[#allocation5 + $0x40] sm:$0xff]  ;;  %v72_v19 = vld [vmem:[#allocation5 + $0x50] sm:$0xff]  ;;  %s193_s24 = sshll.u32 %s316_s21, 4  ;;  %s194_s24 = int_to_ptr.vmem [resolvable:$true] %s193_s24 }
  0x2b   :  { %206 = vmatprep.subr.bf16.mxu0 %v205_v7  ;;  %v213_v17 = vpack.c.bf16 %v73_v15, %v71_v14  ;;  %v75_v20 = vld [vmem:[#allocation5 + $0x68] sm:$0xff]  ;;  %v77_v21 = vld [vmem:[#allocation5 + $0x78] sm:$0xff]  ;;  %v215_v22 = vpack.c.bf16 %v72_v19, %v70_v18  ;;  %v74_v24 = vld [vmem:[#allocation5 + $0x60] sm:$0xff]  ;;  %v90_v46 = vsub.s32 0, %v89_v45  ;;  %v94_v48 = vsub.s32 1, %v89_v45  ;;  %s281_s25 = scalar_lea.vmem %s194_s24, 64  ;;  %p286_p3 = scmp.lt.s32.totalorder %s194_s24, %s194_s24 }
  0x2c   :  { %55 = vrot.lane.b32.xlu0 %v49_v2, %s315_s1  ;;  %208 = vmatpush1.bf16.msra.mxu0 %v207_v8  ;;  %v217_v23 = vpack.c.bf16 %v77_v21, %v75_v20  ;;  %v76_v25 = vld [vmem:[#allocation5 + $0x70] sm:$0xff]  ;;  %v79_v26 = vld [vmem:[#allocation5 + $0x88] sm:$0xff]  ;;  %v81_v27 = vld [vmem:[#allocation5 + $0x98] sm:$0xff]  ;;  %p282_p2 = scmp.ne.s32.totalorder %s194_s24, %s281_s25  ;;  %p287_p4 = scmp.lt.s32.totalorder %s281_s25, %s281_s25 }
  0x2d   :  { %210 = vmatprep.subr.bf16.mxu0 %v209_v12  ;;  %v219_v28 = vpack.c.bf16 %v76_v25, %v74_v24  ;;  %v221_v29 = vpack.c.bf16 %v81_v27, %v79_v26  ;;  %v78_v30 = vld [vmem:[#allocation5 + $0x80] sm:$0xff]  ;;  %v80_v31 = vld [vmem:[#allocation5 + $0x90] sm:$0xff]  ;;  %v83_v32 = vld [vmem:[#allocation5 + $0xa8] sm:$0xff] }
  0x2e   :  { %v85_v33 = vld [vmem:[#allocation5 + $0xb8] sm:$0xff]  ;;  %v223_v34 = vpack.c.bf16 %v80_v31, %v78_v30  ;;  %v82_v36 = vld [vmem:[#allocation5 + $0xa0] sm:$0xff]  ;;  %v84_v37 = vld [vmem:[#allocation5 + $0xb0] sm:$0xff]  ;;  %p288_p5 = por %p287_p4, %p286_p3 }
  0x2f   :  { %v225_v35 = vpack.c.bf16 %v85_v33, %v83_v32  ;;  %v227_v38 = vpack.c.bf16 %v84_v37, %v82_v36  ;;  %v47_v40 = vld [vmem:[#allocation2] sm:$0x3] }
  0x30   :  { %212 = vmatpush1.bf16.msra.mxu0 %v211_v16  ;;  %v86_v47 = vld [vmem:[%s403_s4] sm:$0x3]  ;;  %p289_p6 = pnand %p288_p5, %p282_p2 }
  0x31   :  { %214 = vmatprep.subr.bf16.mxu0 %v213_v17  ;;  %v91_v49 = vrot.slane %v86_v47, %v90_v46  ;;  %v95_v50 = vrot.slane %v86_v47, %v94_v48 }
  0x34   :  { %216 = vmatpush1.bf16.msra.mxu0 %v215_v22 }
  0x35   :  { %218 = vmatprep.subr.bf16.mxu0 %v217_v23 }
  0x38   :  { %220 = vmatpush1.bf16.msra.mxu0 %v219_v28 }
  0x39   :  { %222 = vmatprep.subr.bf16.mxu0 %v221_v29 }
  0x3c   :  { %224 = vmatpush1.bf16.msra.mxu0 %v223_v34 }
  0x3d   :  { %226 = vmatprep.subr.bf16.mxu0 %v225_v35 }
  0x40   :  { %228 = vmatpush1.bf16.msra.mxu0 %v227_v38 }
  0x9a   :  { %v52_v39 = vpop.permute.xlu0 %51 }
  0x9b   :  { %v59_v41 = vsel %vm58_vm0, %v47_v40, %v52_v39 }
  0x9e   :  { %v56_v42 = vpop.permute.xlu0 %55 }
  0x9f   :  { %v61_v43 = vsel %vm60_vm1, %v59_v41, %v56_v42 }
  0xa0   :  { %203 = vmatmul.mubr.msk.f32.vlgmr.msra.gmra.mrb[0].mxu0 %vm98_vm2, %v61_v43 }
 0x173   :  { %v168_v51 = vpop.f32.mrb[0].mxu0 }
 0x174   :  { %v169_v52 = vadd.f32 %v168_v51, %v91_v49  ;;  %v170_v53 = vpop.f32.mrb[1].mxu0 }
 0x175   :  { %v171_v54 = vadd.f32 %v170_v53, %v95_v50 }
 0x176   :  { %v173_v55 = vmax.f32 %v169_v52, 0.0 }
 0x177   :  { %v174_v56 = vmax.f32 %v171_v54, 0.0 }
 0x179   :  { %v177_v57 = vcombine.low %v173_v55, %v174_v56 }
 0x17b   :  { %204 = vst.sshfl [vmem:[#allocation7] sm:$0x33 pattern:$0x76325410] %v177_v57 }
 0x17c   :  { %292 = shalt.err (!%p289_p6)
}
 0x17d   :  { %s293_s27 = scalar_lea.hbm %s404_s5, 64 }
 0x17e   :  { %p294_p7 = scmp.ne.s32.totalorder %s404_s5, %s293_s27  ;;  %p297_p8 = scmp.lt.u32.totalorder %s293_s27, %s404_s5 }
 0x180   :  { %p299_p9 = pnand %p297_p8, %p294_p7 }
 0x182   :  { %302 = shalt.err (!%p299_p9)
}
 0x183   :  { %196 = dma.vmem_to_hbm [thread:$0]  %s194_s24, 64, %s404_s5, [#allocation4]  }
 0x184   :  { %307 = dma.done.wait [#allocation4], 64  }
 0x185   :  { %308 = vsyncadd [#allocation4], 4294967232 }
 0x186   :  { %200 = vsyncpa [#allocation3], 1 }
 0x187   :  { %201 = vsyncpa [#allocation6], 1 }
 0x188   :  { %202 = vsyncpa [#allocation4], 1 }

</bundles_post_ra>
